<compile_context>
chip_gen: v7x
topology: tpu7x:2x2x1
jax: 0.10.0
libtpu: 0.0.40
codegen_flags: <defaults>
</compile_context>

<pallas_src>
import functools

import jax
import jax.numpy as jnp
from jax.experimental import pallas as pl
from jax.experimental.pallas import tpu as pltpu


def _round_up(x, m):
    return ((x + m - 1) // m) * m


# Conservative, explicit VMEM sizing that works on every generation
# (v7x: 64 MiB physical / 32 MiB scoped default; v5e/v6e: 128 MiB physical).
_VMEM_LIMIT_BYTES = 64 * 1024 * 1024
_TILE_VMEM_BUDGET = 16 * 1024 * 1024  # double-buffered tiles must fit here


def _choose_tile_m(m_rows, k_dim, cout_pad):
    """Pick the M-tile size from the VMEM budget (double-buffered blocks)."""
    # Per M-row footprint: 2 bufs * k_dim bf16 (patches) + 2 bufs * cout_pad f32 (out).
    per_row = 2 * k_dim * 2 + 2 * cout_pad * 4
    tile = _TILE_VMEM_BUDGET // per_row
    tile = min(tile, 1024, _round_up(m_rows, 8))  # 256-1024 rows is the sweet spot
    tile = max(8, (tile // 8) * 8)                # sublane-aligned
    return tile


# ----------------------------------------------------------------------------
# Pallas kernel: one M-tile of   out = relu?( patches @ weights + bias )
# ----------------------------------------------------------------------------
def _conv_gemm_kernel(p_ref, w_ref, b_ref, o_ref, *, apply_relu):
    # p_ref: (TILE_M, K) bf16, w_ref: (K, Cout_pad) bf16, b_ref: (1, Cout_pad) f32
    acc = jnp.dot(p_ref[...], w_ref[...], preferred_element_type=jnp.float32)
    acc = acc + b_ref[...]  # bias broadcasts over the TILE_M rows, f32 on VPU
    if apply_relu:
        acc = jnp.maximum(acc, 0.0)
    o_ref[...] = acc.astype(o_ref.dtype)


def conv2d_relu_pallas(x_nhwc, weight, bias, stride, apply_relu):
    """One Conv2d(kernel=K, stride, padding=K//2) [+ ReLU] layer.

    x_nhwc : (B, H, W, Cin) float32
    weight : (Cout, Cin, K, K) float32   (PyTorch Conv2d layout)
    bias   : (Cout,) float32
    returns: (B, Ho, Wo, Cout) float32
    """
    B, H, W, Cin = x_nhwc.shape
    Cout, _, KH, KW = weight.shape
    pad_h, pad_w = KH // 2, KW // 2

    Ho = (H + 2 * pad_h - KH) // stride + 1
    Wo = (W + 2 * pad_w - KW) // stride + 1
    M = B * Ho * Wo
    T = KH * KW
    Kdim = T * Cin
    Cout_pad = _round_up(Cout, 128)  # lane-dense output stores

    # ---- glue: im2col, materialized once as a (M, T*Cin) bf16 slab ----------
    x_bf16 = x_nhwc.astype(jnp.bfloat16)
    x_pad = jnp.pad(x_bf16, ((0, 0), (pad_h, pad_h), (pad_w, pad_w), (0, 0)))
    taps = []
    for kh in range(KH):
        for kw in range(KW):
            taps.append(
                x_pad[
                    :,
                    kh : kh + stride * (Ho - 1) + 1 : stride,
                    kw : kw + stride * (Wo - 1) + 1 : stride,
                    :,
                ]
            )
    # (B, Ho, Wo, T, Cin) -> (M, T*Cin); feature index = (kh*KW + kw)*Cin + cin
    patches = jnp.stack(taps, axis=3).reshape(M, Kdim)

    # weights (Cout, Cin, KH, KW) -> (KH, KW, Cin, Cout) -> (T*Cin, Cout_pad) bf16
    w2d = jnp.transpose(weight, (2, 3, 1, 0)).reshape(Kdim, Cout)
    w2d = jnp.pad(w2d, ((0, 0), (0, Cout_pad - Cout))).astype(jnp.bfloat16)
    b2d = jnp.pad(bias, (0, Cout_pad - Cout)).reshape(1, Cout_pad).astype(jnp.float32)

    # ---- M tiling sized against the VMEM budget ------------------------------
    tile_m = _choose_tile_m(M, Kdim, Cout_pad)
    M_pad = _round_up(M, tile_m)
    if M_pad != M:
        patches = jnp.pad(patches, ((0, M_pad - M), (0, 0)))

    kernel = functools.partial(_conv_gemm_kernel, apply_relu=apply_relu)

    out = pl.pallas_call(
        kernel,
        out_shape=jax.ShapeDtypeStruct((M_pad, Cout_pad), jnp.float32),
        grid_spec=pltpu.PrefetchScalarGridSpec(
            num_scalar_prefetch=0,
            grid=(M_pad // tile_m,),
            in_specs=[
                pl.BlockSpec((tile_m, Kdim), lambda m: (m, 0)),
                pl.BlockSpec((Kdim, Cout_pad), lambda m: (0, 0)),
                pl.BlockSpec((1, Cout_pad), lambda m: (0, 0)),
            ],
            out_specs=pl.BlockSpec((tile_m, Cout_pad), lambda m: (m, 0)),
        ),
        compiler_params=pltpu.CompilerParams(
            dimension_semantics=("parallel",),
            vmem_limit_bytes=_VMEM_LIMIT_BYTES,
        ),
    )(patches, w2d, b2d)

    # Strip M / Cout padding, restore NHWC.
    return out[:M, :Cout].reshape(B, Ho, Wo, Cout)


# ----------------------------------------------------------------------------
# CNNEncoder wrapper (Conv2dStack forward)
# ----------------------------------------------------------------------------
def init_cnn_encoder_params(key, in_channels, out_channels, kernel_sizes):
    """Deterministic synthetic parameters with PyTorch Conv2d shapes."""
    params = []
    chans = [in_channels] + list(out_channels)
    for i, (cout, k) in enumerate(zip(out_channels, kernel_sizes)):
        cin = chans[i]
        key, wk, bk = jax.random.split(key, 3)
        fan_in = cin * k * k
        w = jax.random.normal(wk, (cout, cin, k, k), jnp.float32) / jnp.sqrt(
            float(fan_in)
        )
        b = 0.01 * jax.random.normal(bk, (cout,), jnp.float32)
        params.append((w, b))
    return params


def cnn_encoder_forward(image_nchw, params, strides, activate_final=True):
    """image_nchw: (B, C, H, W) — matches the PyTorch module's input layout."""
    x = jnp.transpose(image_nchw, (0, 2, 3, 1))  # NCHW -> NHWC
    n = len(params)
    for i, ((w, b), s) in enumerate(zip(params, strides)):
        apply_relu = (i < n - 1) or activate_final
        x = conv2d_relu_pallas(x, w, b, s, apply_relu)
    return jnp.transpose(x, (0, 3, 1, 2))  # NHWC -> NCHW


if __name__ == "__main__":
    # Small config consistent with the module:
    #   input_shape = (4, 16, 16)  (C, H, W), batch = 2
    #   out_channels = (32, 32), kernel_sizes = (3, 3), strides = (2, 1)
    batch = 2
    input_shape = (4, 16, 16)
    out_channels = (32, 32)
    kernel_sizes = (3, 3)
    strides = (2, 1)

    key = jax.random.PRNGKey(0)
    key, xk = jax.random.split(key)
    image = jax.random.normal(
        xk, (batch,) + input_shape, dtype=jnp.float32
    )  # NCHW, like PyTorch

    params = init_cnn_encoder_params(
        key, input_shape[0], out_channels, kernel_sizes
    )

    out = cnn_encoder_forward(image, params, strides, activate_final=True)
    out = jax.block_until_ready(out)

    # Expected output shape: (B, 32, 8, 8)  [stride 2 then stride 1, SAME pad]
    assert out.shape == (batch, out_channels[-1], 8, 8), out.shape
    assert bool(jnp.all(out >= 0.0))  # activate_final=True -> ReLU'd output
    print("KERNEL_OK")
</pallas_src>

<mosaic_0001>
module attributes {stable_mosaic.version = 11 : i64} {
  func.func @_conv_gemm_kernel(%arg0: i32, %arg1: memref<128x36xbf16, #tpu.memory_space<vmem>>, %arg2: memref<36x128xbf16, #tpu.memory_space<vmem>>, %arg3: memref<1x128xf32, #tpu.memory_space<vmem>>, %arg4: memref<128x128xf32, #tpu.memory_space<vmem>>) attributes {dimension_semantics = [#tpu.dimension_semantics<parallel>], iteration_bounds = array<i64: 1>, scalar_prefetch = 0 : i64, scratch_operands = 0 : i64, tpu.core_type = #tpu.core_type<tc>, window_params = [{transform_indices = @transform_0, window_bounds = array<i64: 128, 36>}, {pipeline_mode = #tpu.pipeline_mode<synchronous>, transform_indices = @transform_1, window_bounds = array<i64: 36, 128>}, {pipeline_mode = #tpu.pipeline_mode<synchronous>, transform_indices = @transform_2, window_bounds = array<i64: 1, 128>}, {transform_indices = @transform_3, window_bounds = array<i64: 128, 128>}]} {
    %c0 = arith.constant 0 : index
    %c0_0 = arith.constant 0 : index
    %0 = vector.load %arg1[%c0, %c0_0] : memref<128x36xbf16, #tpu.memory_space<vmem>>, vector<128x36xbf16>
    %c0_1 = arith.constant 0 : index
    %c0_2 = arith.constant 0 : index
    %1 = vector.load %arg2[%c0_1, %c0_2] : memref<36x128xbf16, #tpu.memory_space<vmem>>, vector<36x128xbf16>
    %cst = arith.constant dense<0.000000e+00> : vector<128x128xf32>
    %2 = tpu.matmul %0, %1, %cst {dimension_numbers = #tpu.dot_dimension_numbers<[1], [0], [0], [1], [0, 0, 1, 1], [], []>} : vector<128x36xbf16>, vector<36x128xbf16>, vector<128x128xf32> -> vector<128x128xf32>
    %c0_3 = arith.constant 0 : index
    %c0_4 = arith.constant 0 : index
    %3 = vector.load %arg3[%c0_3, %c0_4] : memref<1x128xf32, #tpu.memory_space<vmem>>, vector<1x128xf32>
    %4 = vector.broadcast %3 : vector<1x128xf32> to vector<128x128xf32>
    %5 = arith.addf %2, %4 : vector<128x128xf32>
    %cst_5 = arith.constant 0.000000e+00 : f32
    %6 = vector.broadcast %cst_5 : f32 to vector<128x128xf32>
    %7 = arith.maximumf %5, %6 : vector<128x128xf32>
    %c0_6 = arith.constant 0 : index
    %c0_7 = arith.constant 0 : index
    %8 = vector.load %arg4[%c0_6, %c0_7] : memref<128x128xf32, #tpu.memory_space<vmem>>, vector<128x128xf32>
    tpu.vector_store %arg4[%c0_6, %c0_7], %7 {strides = array<i32>} : memref<128x128xf32, #tpu.memory_space<vmem>>, vector<128x128xf32>,
    return
  }
  func.func @transform_0(%arg0: i32) -> (i32, i32) {
    %c0_i32 = arith.constant 0 : i32
    %c0_i32_0 = arith.constant 0 : i32
    return %arg0, %c0_i32 : i32, i32
  }
  func.func @transform_1(%arg0: i32) -> (i32, i32) {
    %c0_i32 = arith.constant 0 : i32
    %c0_i32_0 = arith.constant 0 : i32
    %c0_i32_1 = arith.constant 0 : i32
    return %c0_i32, %c0_i32_0 : i32, i32
  }
  func.func @transform_2(%arg0: i32) -> (i32, i32) {
    %c0_i32 = arith.constant 0 : i32
    %c0_i32_0 = arith.constant 0 : i32
    %c0_i32_1 = arith.constant 0 : i32
    return %c0_i32, %c0_i32_0 : i32, i32
  }
  func.func @transform_3(%arg0: i32) -> (i32, i32) {
    %c0_i32 = arith.constant 0 : i32
    %c0_i32_0 = arith.constant 0 : i32
    return %arg0, %c0_i32 : i32, i32
  }
}

</mosaic_0001>

<bundles_post_ra>
// kernel: tpu_custom_call.1
= control target key start
LH: loop header
LB: loop body
LE: loop exit
PB: predicated region body
PF: predicated region fallthrough
CT: control target
= control target key end

     0   :  { %8 = vsyncpa [#allocation3], 0  ;;  %s579_s0 = inlined_call_operand.hbm [shape: bf16[128,36], index: 0, kind: input, shape index: {}]   ;;  %s580_s1 = inlined_call_operand.hbm [shape: bf16[36,128], index: 1, kind: input, shape index: {}]   ;;  %s581_s2 = inlined_call_operand.hbm [shape: f32[1,128], index: 2, kind: input, shape index: {}]   ;;  %s582_s3 = inlined_call_operand.hbm [shape: f32[128,128], index: 3, kind: output, shape index: {}]  }
   0x1   :  { %9 = vsyncpa [#allocation6], 0 }
   0x2   :  { %10 = vsyncpa [#allocation4], 0  ;;  %s488_s12 = smov [#allocation5]   ;;  %s489_s14 = smov [#allocation2]  }
   0x3   :  { %s28_s13 = sshll.u32 %s488_s12, 4  ;;  %s16_s15 = sshll.u32 %s489_s14, 4  ;;  %s29_s13 = int_to_ptr.vmem [resolvable:$true] %s28_s13  ;;  %s516_s15 = int_to_ptr.vmem [resolvable:$true] %s16_s15 }
   0x4   :  { %s394_s18 = scalar_lea.hbm %s580_s1, 320 }
   0x5   :  { %p395_p0 = scmp.ne.s32.totalorder %s580_s1, %s394_s18  ;;  %p398_p1 = scmp.lt.u32.totalorder %s394_s18, %s580_s1 }
   0x7   :  { %p400_p2 = pnand %p398_p1, %p395_p0 }
   0x9   :  { %403 = shalt.err (!%p400_p2)
}
   0xa   :  { %s404_s23 = scalar_lea.vmem %s29_s13, 320  ;;  %p409_p4 = scmp.lt.s32.totalorder %s29_s13, %s29_s13 }
   0xb   :  { %p405_p3 = scmp.ne.s32.totalorder %s29_s13, %s404_s23  ;;  %p410_p5 = scmp.lt.s32.totalorder %s404_s23, %s404_s23 }
   0xd   :  { %p411_p6 = por %p410_p5, %p409_p4 }
   0xf   :  { %p412_p7 = pnand %p411_p6, %p405_p3 }
  0x11   :  { %415 = shalt.err (!%p412_p7)
}
  0x12   :  { %s490_s24 = smov 64   ;;  %s491_s25 = smov 4  }
  0x13   :  { %34 = dma.hbm_to_vmem [thread:$0]  %s580_s1, 320, %s29_s13, [#allocation6], %s490_s24, %s490_s24, %s491_s25  }
  0x14   :  { %s416_s30 = scalar_lea.hbm %s579_s0, 1024 }
  0x15   :  { %p417_p8 = scmp.ne.s32.totalorder %s579_s0, %s416_s30  ;;  %p420_p9 = scmp.lt.u32.totalorder %s416_s30, %s579_s0 }
  0x17   :  { %p422_p10 = pnand %p420_p9, %p417_p8 }
  0x19   :  { %425 = shalt.err (!%p422_p10)
}
  0x1a   :  { %s426_s8 = scalar_lea.vmem %s516_s15, 1024  ;;  %p431_p12 = scmp.lt.s32.totalorder %s516_s15, %s516_s15 }
  0x1b   :  { %p427_p11 = scmp.ne.s32.totalorder %s516_s15, %s426_s8  ;;  %p432_p13 = scmp.lt.s32.totalorder %s426_s8, %s426_s8 }
  0x1d   :  { %p433_p0 = por %p432_p13, %p431_p12 }
  0x1f   :  { %p434_p1 = pnand %p433_p0, %p427_p11 }
  0x21   :  { %437 = shalt.err (!%p434_p1)
}
  0x22   :  { %22 = dma.hbm_to_vmem [thread:$0]  %s579_s0, 1024, %s516_s15, [#allocation3], %s490_s24, %s490_s24, %s491_s25  }
  0x23   :  { %s492_s10 = smov [#allocation7]   ;;  %s438_s14 = scalar_lea.hbm %s581_s2, 16 }
  0x24   :  { %s41_s11 = sshll.u32 %s492_s10, 4  ;;  %p439_p2 = scmp.ne.s32.totalorder %s581_s2, %s438_s14  ;;  %s42_s11 = int_to_ptr.vmem [resolvable:$true] %s41_s11 }
  0x25   :  { %p442_p3 = scmp.lt.u32.totalorder %s438_s14, %s581_s2 }
  0x27   :  { %p444_p4 = pnand %p442_p3, %p439_p2 }
  0x29   :  { %447 = shalt.err (!%p444_p4)
}
  0x2a   :  { %s448_s20 = scalar_lea.vmem %s42_s11, 16  ;;  %s452_s0 = scalar_lea.vmem %s42_s11, 32 }
  0x2b   :  { %p449_p5 = scmp.ne.s32.totalorder %s42_s11, %s448_s20  ;;  %p453_p6 = scmp.lt.s32.totalorder %s42_s11, %s42_s11 }
  0x2c   :  { %p454_p7 = scmp.lt.s32.totalorder %s452_s0, %s448_s20 }
  0x2e   :  { %p455_p8 = por %p454_p7, %p453_p6 }
  0x30   :  { %p456_p9 = pnand %p455_p8, %p449_p5 }
  0x32   :  { %459 = shalt.err (!%p456_p9)
}
  0x33   :  { %44 = dma.hbm_to_vmem [thread:$0]  %s581_s2, 16, %s42_s11, [#allocation6]  }
  0x34   :  { %482 = dma.done.wait [#allocation3], 1024  }
  0x35   :  { %483 = vsyncadd [#allocation3], 4294966272 }
  0x36   :  { %484 = dma.done.wait [#allocation6], 336  }
  0x37   :  { %485 = vsyncadd [#allocation6], 4294966960  ;;  %v383_v0 = vld [vmem:[#allocation5] sm:$0xff]   ;;  %v384_v1 = vld [vmem:[#allocation5 + $0x8] sm:$0xff]   ;;  %vm138_vm0 = vcmask 293888   ;;  %vm163_vm1 = vcmask 1041408  }
  0x38   :  { %345 = vmatprep.subr.bf16.mxu0 %v383_v0  ;;  %367 = vmatprep.subr.bf16.mxu1 %v383_v0  ;;  %v385_v2 = vld [vmem:[#allocation5 + $0x10] ss:$0 sps:$4 sm:$0x33]   ;;  %v386_v3 = vld [vmem:[#allocation2] sm:$0xff]   ;;  %v388_v6 = vld [vmem:[#allocation2 + $0x8] sm:$0xff]   ;;  %s493_s2 = smov [#allocation8]  }
  0x39   :  { %346 = vmatpush3.bf16.msra.mxu0 %v383_v0  ;;  %370 = vmatpush3.bf16.msra.mxu1 %v383_v0  ;;  %v387_v4 = vld [vmem:[#allocation2 + $0x20] sm:$0xff]   ;;  %v165_v5 = vsel %vm163_vm1, %v385_v2, 0  ;;  %v389_v7 = vld [vmem:[#allocation2 + $0x28] sm:$0xff]   ;;  %v390_v8 = vld [vmem:[#allocation2 + $0x10] sm:$0xff]   ;;  %s301_s22 = sshll.u32 %s493_s2, 4  ;;  %s302_s22 = int_to_ptr.vmem [resolvable:$true] %s301_s22 }
  0x3a   :  { %347 = vmatprep.subr.bf16.mxu0 %v384_v1  ;;  %368 = vmatprep.subr.bf16.mxu1 %v384_v1  ;;  %v391_v9 = vld [vmem:[#allocation2 + $0x30] sm:$0xff]   ;;  %v392_v10 = vld [vmem:[#allocation2 + $0x18] sm:$0xff]   ;;  %s460_s23 = scalar_lea.vmem %s302_s22, 2048  ;;  %p465_p11 = scmp.lt.s32.totalorder %s302_s22, %s302_s22 }
  0x3b   :  { %351 = vmatprep.mubr.msk.bf16.mxu0 %vm138_vm0, %v386_v3  ;;  %359 = vmatprep.mubr.msk.bf16.mxu1 %vm138_vm0, %v387_v4  ;;  %v393_v11 = vld [vmem:[#allocation2 + $0x38] sm:$0xff]   ;;  %v314_v12 = vld [vmem:[#allocation7] ss:$0 sm:$0xff]  ;;  %p461_p10 = scmp.ne.s32.totalorder %s302_s22, %s460_s23  ;;  %p466_p12 = scmp.lt.s32.totalorder %s460_s23, %s460_s23 }
  0x3d   :  { %348 = vmatpush3.bf16.msra.mxu0 %v384_v1  ;;  %371 = vmatpush3.bf16.msra.mxu1 %v384_v1  ;;  %p467_p13 = por %p466_p12, %p465_p11 }
  0x3e   :  { %373 = vmatprep.subr.msk.bf16.mxu0 %vm163_vm1, %v385_v2  ;;  %374 = vmatprep.subr.msk.bf16.mxu1 %vm163_vm1, %v385_v2 }
  0x3f   :  { %p468_p0 = pnand %p467_p13, %p461_p10 }
  0x41   :  { %350 = vmatpush3.bf16.msra.mxu0 %v165_v5  ;;  %372 = vmatpush3.bf16.msra.mxu1 %v165_v5 }
  0x44   :  { %352 = vmatmul.mubr.msk.bf16.vlgmr.msra.gmra.mrb[0].mxu0 %vm138_vm0, %v388_v6  ;;  %360 = vmatmul.mubr.msk.bf16.vlgmr.msra.gmra.mrb[0].mxu1 %vm138_vm0, %v389_v7 }
  0x45   :  { %355 = vmatprep.mubr.msk.bf16.mxu0 %vm138_vm0, %v390_v8  ;;  %363 = vmatprep.mubr.msk.bf16.mxu1 %vm138_vm0, %v391_v9 }
  0x4c   :  { %356 = vmatmul.mubr.msk.bf16.gmra.mrb[4].mxu0 %vm138_vm0, %v392_v10  ;;  %364 = vmatmul.mubr.msk.bf16.gmra.mrb[4].mxu1 %vm138_vm0, %v393_v11 }
 0x117   :  { %v353_v13 = vpop.f32.mrb[0].mxu0  ;;  %v361_v14 = vpop.f32.mrb[0].mxu1 }
 0x118   :  { %v210_v15 = vadd.f32 %v353_v13, %v314_v12  ;;  %v242_v16 = vadd.f32 %v361_v14, %v314_v12  ;;  %v201_v17 = vpop.f32.mrb[1].mxu0  ;;  %v233_v18 = vpop.f32.mrb[1].mxu1 }
 0x119   :  { %v202_v19 = vadd.f32 %v314_v12, %v201_v17  ;;  %v234_v20 = vadd.f32 %v314_v12, %v233_v18  ;;  %v354_v21 = vpop.f32.mrb[2].mxu0  ;;  %v362_v22 = vpop.f32.mrb[2].mxu1 }
 0x11a   :  { %v266_v23 = vmax.f32 %v210_v15, 0.0  ;;  %v274_v24 = vmax.f32 %v242_v16, 0.0  ;;  %v213_v25 = vadd.f32 %v354_v21, %v314_v12  ;;  %v245_v26 = vadd.f32 %v362_v22, %v314_v12  ;;  %v204_v27 = vpop.f32.mrb[3].mxu0  ;;  %v236_v28 = vpop.f32.mrb[3].mxu1 }
 0x11b   :  { %v264_v29 = vmax.f32 %v202_v19, 0.0  ;;  %v272_v30 = vmax.f32 %v234_v20, 0.0  ;;  %v205_v31 = vadd.f32 %v314_v12, %v204_v27  ;;  %v237_v32 = vadd.f32 %v314_v12, %v236_v28 }
 0x11c   :  { %282 = vst [vmem:[#allocation8 + $0x10] sm:$0xff] %v266_v23  ;;  %290 = vst [vmem:[#allocation8 + $0x50] sm:$0xff] %v274_v24  ;;  %v267_v33 = vmax.f32 %v213_v25, 0.0  ;;  %v275_v34 = vmax.f32 %v245_v26, 0.0 }
 0x11d   :  { %280 = vst [vmem:[#allocation8] sm:$0xff] %v264_v29  ;;  %288 = vst [vmem:[#allocation8 + $0x40] sm:$0xff] %v272_v30  ;;  %v265_v35 = vmax.f32 %v205_v31, 0.0  ;;  %v273_v36 = vmax.f32 %v237_v32, 0.0 }
 0x11e   :  { %283 = vst [vmem:[#allocation8 + $0x18] sm:$0xff] %v267_v33  ;;  %291 = vst [vmem:[#allocation8 + $0x58] sm:$0xff] %v275_v34 }
 0x11f   :  { %281 = vst [vmem:[#allocation8 + $0x8] sm:$0xff] %v265_v35  ;;  %289 = vst [vmem:[#allocation8 + $0x48] sm:$0xff] %v273_v36  ;;  %v357_v37 = vpop.f32.mrb[4].mxu0  ;;  %v365_v38 = vpop.f32.mrb[4].mxu1 }
 0x120   :  { %v226_v39 = vadd.f32 %v357_v37, %v314_v12  ;;  %v258_v40 = vadd.f32 %v365_v38, %v314_v12  ;;  %v217_v41 = vpop.f32.mrb[5].mxu0  ;;  %v249_v42 = vpop.f32.mrb[5].mxu1 }
 0x121   :  { %v218_v43 = vadd.f32 %v314_v12, %v217_v41  ;;  %v250_v44 = vadd.f32 %v314_v12, %v249_v42  ;;  %v358_v45 = vpop.f32.mrb[6].mxu0  ;;  %v366_v46 = vpop.f32.mrb[6].mxu1 }
 0x122   :  { %v270_v47 = vmax.f32 %v226_v39, 0.0  ;;  %v278_v48 = vmax.f32 %v258_v40, 0.0  ;;  %v229_v49 = vadd.f32 %v358_v45, %v314_v12  ;;  %v261_v50 = vadd.f32 %v366_v46, %v314_v12  ;;  %v220_v51 = vpop.f32.mrb[7].mxu0  ;;  %v252_v52 = vpop.f32.mrb[7].mxu1 }
 0x123   :  { %v268_v53 = vmax.f32 %v218_v43, 0.0  ;;  %v276_v54 = vmax.f32 %v250_v44, 0.0  ;;  %v221_v55 = vadd.f32 %v314_v12, %v220_v51  ;;  %v253_v56 = vadd.f32 %v314_v12, %v252_v52 }
 0x124   :  { %286 = vst [vmem:[#allocation8 + $0x30] sm:$0xff] %v270_v47  ;;  %294 = vst [vmem:[#allocation8 + $0x70] sm:$0xff] %v278_v48  ;;  %v271_v57 = vmax.f32 %v229_v49, 0.0  ;;  %v279_v58 = vmax.f32 %v261_v50, 0.0 }
 0x125   :  { %284 = vst [vmem:[#allocation8 + $0x20] sm:$0xff] %v268_v53  ;;  %292 = vst [vmem:[#allocation8 + $0x60] sm:$0xff] %v276_v54  ;;  %v269_v59 = vmax.f32 %v221_v55, 0.0  ;;  %v277_v60 = vmax.f32 %v253_v56, 0.0 }
 0x126   :  { %287 = vst [vmem:[#allocation8 + $0x38] sm:$0xff] %v271_v57  ;;  %295 = vst [vmem:[#allocation8 + $0x78] sm:$0xff] %v279_v58 }
 0x127   :  { %285 = vst [vmem:[#allocation8 + $0x28] sm:$0xff] %v269_v59  ;;  %293 = vst [vmem:[#allocation8 + $0x68] sm:$0xff] %v277_v60 }
 0x128   :  { %471 = shalt.err (!%p468_p0)
}
 0x129   :  { %s472_s26 = scalar_lea.hbm %s582_s3, 2048 }
 0x12a   :  { %p473_p1 = scmp.ne.s32.totalorder %s582_s3, %s472_s26  ;;  %p476_p2 = scmp.lt.u32.totalorder %s472_s26, %s582_s3 }
 0x12c   :  { %p478_p3 = pnand %p476_p2, %p473_p1 }
 0x12e   :  { %481 = shalt.err (!%p478_p3)
}
 0x12f   :  { %s494_s4 = smov 128   ;;  %s495_s5 = smov 8  }
 0x130   :  { %307 = dma.vmem_to_hbm [thread:$0]  %s302_s22, 2048, %s582_s3, [#allocation4], %s494_s4, %s494_s4, %s495_s5  }
 0x131   :  { %486 = dma.done.wait [#allocation4], 2048  }
 0x132   :  { %487 = vsyncadd [#allocation4], 4294965248 }
 0x133   :  { %311 = vsyncpa [#allocation3], 1 }
 0x134   :  { %312 = vsyncpa [#allocation6], 1 }
 0x135   :  { %313 = vsyncpa [#allocation4], 1 }

</bundles_post_ra>
